<compile_context>
chip_gen: v5e
topology: v5e:2x2
jax: 0.10.0
libtpu: 0.0.40
codegen_flags: <defaults>
</compile_context>

<pallas_src>
import jax
import jax.numpy as jnp
from jax.experimental import pallas as pl
from jax.experimental.pallas import tpu as pltpu


def _relu(x):
    return jnp.maximum(x, 0.0)


def make_fused_resnet_kernel(num_blocks):
    """Kernel over one batch tile: chains `num_blocks` ResNetBlocks in-VMEM."""

    def kernel(*refs):
        x_ref, o_ref = refs[0], refs[-1]
        params = refs[1:-1]            # 8 refs per block
        h = x_ref[...].astype(jnp.float32)
        for b in range(num_blocks):    # unrolled at trace time
            win, bin_, w0, b0, w1, b1, wout, bout = params[8 * b: 8 * b + 8]
            h0 = _relu(jnp.dot(h.astype(jnp.bfloat16), win[...],
                               preferred_element_type=jnp.float32) + bin_[...])
            h1 = _relu(jnp.dot(h0.astype(jnp.bfloat16), w0[...],
                               preferred_element_type=jnp.float32) + b0[...])
            h2 = _relu(jnp.dot(h1.astype(jnp.bfloat16), w1[...],
                               preferred_element_type=jnp.float32) + b1[...])
            h3 = _relu(h2 + h0)        # ReLU(out + res_in)
            h = _relu(jnp.dot(h3.astype(jnp.bfloat16), wout[...],
                              preferred_element_type=jnp.float32) + bout[...])
        o_ref[...] = h.astype(o_ref.dtype)

    return kernel


def _round_up(x, m):
    return (x + m - 1) // m * m


def resnet_forward(x, blocks, *, batch_tile=512):
    """Full ResNet forward as a single batch-tiled Pallas call."""
    batch, in_size = x.shape
    num_blocks = len(blocks)
    out_size = blocks[-1][6].shape[1]          # wout of last block: [res, out]

    # Sublane-aligned batch tile; pad batch so the tile divides it evenly.
    tb = min(batch_tile, _round_up(batch, 8))
    padded = _round_up(batch, tb)
    x_p = x if padded == batch else jnp.pad(x, ((0, padded - batch), (0, 0)))
    grid = (padded // tb,)

    flat_params = [p for bp in blocks for p in bp]

    # Activation tile moves with the batch grid; params pinned (constant index
    # map -> DMA'd once, VMEM-resident across all batch steps).
    in_specs = [pl.BlockSpec((tb, in_size), lambda i: (i, 0))]
    for p in flat_params:
        in_specs.append(pl.BlockSpec(p.shape, lambda i: (0, 0)))
    out_spec = pl.BlockSpec((tb, out_size), lambda i: (i, 0))

    flops = 0
    for (win, _bin, w0, _b0, w1, _b1, wout, _bout) in blocks:
        flops += 2 * padded * (win.shape[0] * win.shape[1]
                               + w0.shape[0] * w0.shape[1]
                               + w1.shape[0] * w1.shape[1]
                               + wout.shape[0] * wout.shape[1])
    bytes_accessed = (x_p.size * x_p.dtype.itemsize
                      + padded * out_size * x.dtype.itemsize
                      + sum(p.size * p.dtype.itemsize for p in flat_params))

    out = pl.pallas_call(
        make_fused_resnet_kernel(num_blocks),
        out_shape=jax.ShapeDtypeStruct((padded, out_size), x.dtype),
        grid=grid,
        in_specs=in_specs,
        out_specs=out_spec,
        compiler_params=pltpu.CompilerParams(
            dimension_semantics=("parallel",)),
        cost_estimate=pl.CostEstimate(flops=flops, transcendentals=0,
                                      bytes_accessed=bytes_accessed),
    )(x_p, *flat_params)

    return out[:batch] if padded != batch else out


# ---------------- parameter construction (glue, plain JAX) ----------------

def _linear_params(key, in_size, out_size):
    """PyTorch-default-style uniform init; weight stored [in, out] as bf16."""
    kw, kb = jax.random.split(key)
    bound = 1.0 / (in_size ** 0.5)
    w = jax.random.uniform(kw, (in_size, out_size), jnp.float32, -bound, bound)
    b = jax.random.uniform(kb, (1, out_size), jnp.float32, -bound, bound)
    return w.astype(jnp.bfloat16), b


def init_resnet_block(key, in_size, out_size, res_size, res_block_size=3):
    assert res_block_size == 3, "kernel is specialized to res_block_size=3 (default)"
    keys = jax.random.split(key, res_block_size + 2)
    win, bin_ = _linear_params(keys[0], in_size, res_size)
    res = [_linear_params(keys[1 + i], res_size, res_size)
           for i in range(res_block_size)]
    wout, bout = _linear_params(keys[res_block_size + 1], res_size, out_size)
    (w0, b0), (w1, b1) = res[0], res[1]   # res[2] exists but is unused by forward
    return (win, bin_, w0, b0, w1, b1, wout, bout)


def init_resnet(key, layer_sizes, input_size, res_sizes, res_block_size=3):
    sizes = [input_size] + list(layer_sizes)
    keys = jax.random.split(key, len(layer_sizes))
    blocks = []
    for i, (start, end) in enumerate(zip(sizes[:-1], sizes[1:])):
        blocks.append(init_resnet_block(keys[i], start, end, res_sizes[i],
                                        res_block_size))
    return blocks


# ---------------- references for verification ----------------

def resnet_forward_ref(x, blocks):
    """Pure-JAX reference mirroring the kernel numerics exactly
    (bf16 matmul operands, f32 accumulation / bias / residual / ReLU)."""
    def mm(a, w):
        return jnp.dot(a.astype(jnp.bfloat16), w,
                       preferred_element_type=jnp.float32)
    out = x.astype(jnp.float32)
    for (win, bin_, w0, b0, w1, b1, wout, bout) in blocks:
        h0 = jax.nn.relu(mm(out, win) + bin_)
        h1 = jax.nn.relu(mm(h0, w0) + b0)
        h2 = jax.nn.relu(mm(h1, w1) + b1)
        h3 = jax.nn.relu(h2 + h0)
        out = jax.nn.relu(mm(h3, wout) + bout)
    return out


def resnet_forward_ref_f32(x, blocks):
    """Pure-f32 reference of the PyTorch forward (loose sanity check for the
    bf16 weight storage)."""
    out = x
    for (win, bin_, w0, b0, w1, b1, wout, bout) in blocks:
        h0 = jax.nn.relu(out @ win.astype(jnp.float32) + bin_)
        h1 = jax.nn.relu(h0 @ w0.astype(jnp.float32) + b0)
        h2 = jax.nn.relu(h1 @ w1.astype(jnp.float32) + b1)
        h3 = jax.nn.relu(h2 + h0)
        out = jax.nn.relu(h3 @ wout.astype(jnp.float32) + bout)
    return out


if __name__ == "__main__":
    key = jax.random.PRNGKey(0)
    k_x, k_p = jax.random.split(key)

    # ResNet(layers=[32, 8], input_size=16, res_sizes=[64, 24], res_block_size=3)
    batch = 4
    input_size = 16
    layer_sizes = [32, 8]
    res_sizes = [64, 24]

    x = jax.random.normal(k_x, (batch, input_size), jnp.float32)
    blocks = init_resnet(k_p, layer_sizes, input_size, res_sizes)

    out = jax.block_until_ready(resnet_forward(x, blocks))

    assert out.shape == (batch, layer_sizes[-1]), out.shape

    ref = resnet_forward_ref(x, blocks)
    assert jnp.allclose(out, ref, atol=1e-3, rtol=1e-3), \
        "mismatch vs bf16-mirror reference"

    ref_f32 = resnet_forward_ref_f32(x, blocks)
    assert jnp.allclose(out, ref_f32, atol=1e-1, rtol=1e-1), \
        "mismatch vs f32 reference (bf16 weight quantization sanity check)"

    print("KERNEL_OK")
</pallas_src>

<mosaic_0001>
module attributes {stable_mosaic.version = 11 : i64} {
  func.func @kernel(%arg0: i32, %arg1: memref<8x16xf32, #tpu.memory_space<vmem>>, %arg2: memref<16x64xbf16, #tpu.memory_space<vmem>>, %arg3: memref<1x64xf32, #tpu.memory_space<vmem>>, %arg4: memref<64x64xbf16, #tpu.memory_space<vmem>>, %arg5: memref<1x64xf32, #tpu.memory_space<vmem>>, %arg6: memref<64x64xbf16, #tpu.memory_space<vmem>>, %arg7: memref<1x64xf32, #tpu.memory_space<vmem>>, %arg8: memref<64x32xbf16, #tpu.memory_space<vmem>>, %arg9: memref<1x32xf32, #tpu.memory_space<vmem>>, %arg10: memref<32x24xbf16, #tpu.memory_space<vmem>>, %arg11: memref<1x24xf32, #tpu.memory_space<vmem>>, %arg12: memref<24x24xbf16, #tpu.memory_space<vmem>>, %arg13: memref<1x24xf32, #tpu.memory_space<vmem>>, %arg14: memref<24x24xbf16, #tpu.memory_space<vmem>>, %arg15: memref<1x24xf32, #tpu.memory_space<vmem>>, %arg16: memref<24x8xbf16, #tpu.memory_space<vmem>>, %arg17: memref<1x8xf32, #tpu.memory_space<vmem>>, %arg18: memref<8x8xf32, #tpu.memory_space<vmem>>) attributes {dimension_semantics = [#tpu.dimension_semantics<parallel>], iteration_bounds = array<i64: 1>, scalar_prefetch = 0 : i64, scratch_operands = 0 : i64, tpu.core_type = #tpu.core_type<tc>, window_params = [{transform_indices = @transform_0, window_bounds = array<i64: 8, 16>}, {pipeline_mode = #tpu.pipeline_mode<synchronous>, transform_indices = @transform_1, window_bounds = array<i64: 16, 64>}, {pipeline_mode = #tpu.pipeline_mode<synchronous>, transform_indices = @transform_2, window_bounds = array<i64: 1, 64>}, {pipeline_mode = #tpu.pipeline_mode<synchronous>, transform_indices = @transform_3, window_bounds = array<i64: 64, 64>}, {pipeline_mode = #tpu.pipeline_mode<synchronous>, transform_indices = @transform_4, window_bounds = array<i64: 1, 64>}, {pipeline_mode = #tpu.pipeline_mode<synchronous>, transform_indices = @transform_5, window_bounds = array<i64: 64, 64>}, {pipeline_mode = #tpu.pipeline_mode<synchronous>, transform_indices = @transform_6, window_bounds = array<i64: 1, 64>}, {pipeline_mode = #tpu.pipeline_mode<synchronous>, transform_indices = @transform_7, window_bounds = array<i64: 64, 32>}, {pipeline_mode = #tpu.pipeline_mode<synchronous>, transform_indices = @transform_8, window_bounds = array<i64: 1, 32>}, {pipeline_mode = #tpu.pipeline_mode<synchronous>, transform_indices = @transform_9, window_bounds = array<i64: 32, 24>}, {pipeline_mode = #tpu.pipeline_mode<synchronous>, transform_indices = @transform_10, window_bounds = array<i64: 1, 24>}, {pipeline_mode = #tpu.pipeline_mode<synchronous>, transform_indices = @transform_11, window_bounds = array<i64: 24, 24>}, {pipeline_mode = #tpu.pipeline_mode<synchronous>, transform_indices = @transform_12, window_bounds = array<i64: 1, 24>}, {pipeline_mode = #tpu.pipeline_mode<synchronous>, transform_indices = @transform_13, window_bounds = array<i64: 24, 24>}, {pipeline_mode = #tpu.pipeline_mode<synchronous>, transform_indices = @transform_14, window_bounds = array<i64: 1, 24>}, {pipeline_mode = #tpu.pipeline_mode<synchronous>, transform_indices = @transform_15, window_bounds = array<i64: 24, 8>}, {pipeline_mode = #tpu.pipeline_mode<synchronous>, transform_indices = @transform_16, window_bounds = array<i64: 1, 8>}, {transform_indices = @transform_17, window_bounds = array<i64: 8, 8>}]} {
    %c0 = arith.constant 0 : index
    %c0_0 = arith.constant 0 : index
    %0 = vector.load %arg1[%c0, %c0_0] : memref<8x16xf32, #tpu.memory_space<vmem>>, vector<8x16xf32>
    %1 = arith.truncf %0 : vector<8x16xf32> to vector<8x16xbf16>
    %c0_1 = arith.constant 0 : index
    %c0_2 = arith.constant 0 : index
    %2 = vector.load %arg2[%c0_1, %c0_2] : memref<16x64xbf16, #tpu.memory_space<vmem>>, vector<16x64xbf16>
    %cst = arith.constant dense<0.000000e+00> : vector<8x64xf32>
    %3 = tpu.matmul %1, %2, %cst {dimension_numbers = #tpu.dot_dimension_numbers<[1], [0], [0], [1], [0, 0, 1, 1], [], []>} : vector<8x16xbf16>, vector<16x64xbf16>, vector<8x64xf32> -> vector<8x64xf32>
    %c0_3 = arith.constant 0 : index
    %c0_4 = arith.constant 0 : index
    %4 = vector.load %arg3[%c0_3, %c0_4] : memref<1x64xf32, #tpu.memory_space<vmem>>, vector<1x64xf32>
    %5 = vector.broadcast %4 : vector<1x64xf32> to vector<8x64xf32>
    %6 = arith.addf %3, %5 : vector<8x64xf32>
    %cst_5 = arith.constant 0.000000e+00 : f32
    %7 = vector.broadcast %cst_5 : f32 to vector<8x64xf32>
    %8 = arith.maximumf %6, %7 : vector<8x64xf32>
    %9 = arith.truncf %8 : vector<8x64xf32> to vector<8x64xbf16>
    %c0_6 = arith.constant 0 : index
    %c0_7 = arith.constant 0 : index
    %10 = vector.load %arg4[%c0_6, %c0_7] : memref<64x64xbf16, #tpu.memory_space<vmem>>, vector<64x64xbf16>
    %cst_8 = arith.constant dense<0.000000e+00> : vector<8x64xf32>
    %11 = tpu.matmul %9, %10, %cst_8 {dimension_numbers = #tpu.dot_dimension_numbers<[1], [0], [0], [1], [0, 0, 1, 1], [], []>} : vector<8x64xbf16>, vector<64x64xbf16>, vector<8x64xf32> -> vector<8x64xf32>
    %c0_9 = arith.constant 0 : index
    %c0_10 = arith.constant 0 : index
    %12 = vector.load %arg5[%c0_9, %c0_10] : memref<1x64xf32, #tpu.memory_space<vmem>>, vector<1x64xf32>
    %13 = vector.broadcast %12 : vector<1x64xf32> to vector<8x64xf32>
    %14 = arith.addf %11, %13 : vector<8x64xf32>
    %cst_11 = arith.constant 0.000000e+00 : f32
    %15 = vector.broadcast %cst_11 : f32 to vector<8x64xf32>
    %16 = arith.maximumf %14, %15 : vector<8x64xf32>
    %17 = arith.truncf %16 : vector<8x64xf32> to vector<8x64xbf16>
    %c0_12 = arith.constant 0 : index
    %c0_13 = arith.constant 0 : index
    %18 = vector.load %arg6[%c0_12, %c0_13] : memref<64x64xbf16, #tpu.memory_space<vmem>>, vector<64x64xbf16>
    %cst_14 = arith.constant dense<0.000000e+00> : vector<8x64xf32>
    %19 = tpu.matmul %17, %18, %cst_14 {dimension_numbers = #tpu.dot_dimension_numbers<[1], [0], [0], [1], [0, 0, 1, 1], [], []>} : vector<8x64xbf16>, vector<64x64xbf16>, vector<8x64xf32> -> vector<8x64xf32>
    %c0_15 = arith.constant 0 : index
    %c0_16 = arith.constant 0 : index
    %20 = vector.load %arg7[%c0_15, %c0_16] : memref<1x64xf32, #tpu.memory_space<vmem>>, vector<1x64xf32>
    %21 = vector.broadcast %20 : vector<1x64xf32> to vector<8x64xf32>
    %22 = arith.addf %19, %21 : vector<8x64xf32>
    %cst_17 = arith.constant 0.000000e+00 : f32
    %23 = vector.broadcast %cst_17 : f32 to vector<8x64xf32>
    %24 = arith.maximumf %22, %23 : vector<8x64xf32>
    %25 = arith.addf %24, %8 : vector<8x64xf32>
    %cst_18 = arith.constant 0.000000e+00 : f32
    %26 = vector.broadcast %cst_18 : f32 to vector<8x64xf32>
    %27 = arith.maximumf %25, %26 : vector<8x64xf32>
    %28 = arith.truncf %27 : vector<8x64xf32> to vector<8x64xbf16>
    %c0_19 = arith.constant 0 : index
    %c0_20 = arith.constant 0 : index
    %29 = vector.load %arg8[%c0_19, %c0_20] : memref<64x32xbf16, #tpu.memory_space<vmem>>, vector<64x32xbf16>
    %cst_21 = arith.constant dense<0.000000e+00> : vector<8x32xf32>
    %30 = tpu.matmul %28, %29, %cst_21 {dimension_numbers = #tpu.dot_dimension_numbers<[1], [0], [0], [1], [0, 0, 1, 1], [], []>} : vector<8x64xbf16>, vector<64x32xbf16>, vector<8x32xf32> -> vector<8x32xf32>
    %c0_22 = arith.constant 0 : index
    %c0_23 = arith.constant 0 : index
    %31 = vector.load %arg9[%c0_22, %c0_23] : memref<1x32xf32, #tpu.memory_space<vmem>>, vector<1x32xf32>
    %32 = vector.broadcast %31 : vector<1x32xf32> to vector<8x32xf32>
    %33 = arith.addf %30, %32 : vector<8x32xf32>
    %cst_24 = arith.constant 0.000000e+00 : f32
    %34 = vector.broadcast %cst_24 : f32 to vector<8x32xf32>
    %35 = arith.maximumf %33, %34 : vector<8x32xf32>
    %36 = arith.truncf %35 : vector<8x32xf32> to vector<8x32xbf16>
    %c0_25 = arith.constant 0 : index
    %c0_26 = arith.constant 0 : index
    %37 = vector.load %arg10[%c0_25, %c0_26] : memref<32x24xbf16, #tpu.memory_space<vmem>>, vector<32x24xbf16>
    %cst_27 = arith.constant dense<0.000000e+00> : vector<8x24xf32>
    %38 = tpu.matmul %36, %37, %cst_27 {dimension_numbers = #tpu.dot_dimension_numbers<[1], [0], [0], [1], [0, 0, 1, 1], [], []>} : vector<8x32xbf16>, vector<32x24xbf16>, vector<8x24xf32> -> vector<8x24xf32>
    %c0_28 = arith.constant 0 : index
    %c0_29 = arith.constant 0 : index
    %39 = vector.load %arg11[%c0_28, %c0_29] : memref<1x24xf32, #tpu.memory_space<vmem>>, vector<1x24xf32>
    %40 = vector.broadcast %39 : vector<1x24xf32> to vector<8x24xf32>
    %41 = arith.addf %38, %40 : vector<8x24xf32>
    %cst_30 = arith.constant 0.000000e+00 : f32
    %42 = vector.broadcast %cst_30 : f32 to vector<8x24xf32>
    %43 = arith.maximumf %41, %42 : vector<8x24xf32>
    %44 = arith.truncf %43 : vector<8x24xf32> to vector<8x24xbf16>
    %c0_31 = arith.constant 0 : index
    %c0_32 = arith.constant 0 : index
    %45 = vector.load %arg12[%c0_31, %c0_32] : memref<24x24xbf16, #tpu.memory_space<vmem>>, vector<24x24xbf16>
    %cst_33 = arith.constant dense<0.000000e+00> : vector<8x24xf32>
    %46 = tpu.matmul %44, %45, %cst_33 {dimension_numbers = #tpu.dot_dimension_numbers<[1], [0], [0], [1], [0, 0, 1, 1], [], []>} : vector<8x24xbf16>, vector<24x24xbf16>, vector<8x24xf32> -> vector<8x24xf32>
    %c0_34 = arith.constant 0 : index
    %c0_35 = arith.constant 0 : index
    %47 = vector.load %arg13[%c0_34, %c0_35] : memref<1x24xf32, #tpu.memory_space<vmem>>, vector<1x24xf32>
    %48 = vector.broadcast %47 : vector<1x24xf32> to vector<8x24xf32>
    %49 = arith.addf %46, %48 : vector<8x24xf32>
    %cst_36 = arith.constant 0.000000e+00 : f32
    %50 = vector.broadcast %cst_36 : f32 to vector<8x24xf32>
    %51 = arith.maximumf %49, %50 : vector<8x24xf32>
    %52 = arith.truncf %51 : vector<8x24xf32> to vector<8x24xbf16>
    %c0_37 = arith.constant 0 : index
    %c0_38 = arith.constant 0 : index
    %53 = vector.load %arg14[%c0_37, %c0_38] : memref<24x24xbf16, #tpu.memory_space<vmem>>, vector<24x24xbf16>
    %cst_39 = arith.constant dense<0.000000e+00> : vector<8x24xf32>
    %54 = tpu.matmul %52, %53, %cst_39 {dimension_numbers = #tpu.dot_dimension_numbers<[1], [0], [0], [1], [0, 0, 1, 1], [], []>} : vector<8x24xbf16>, vector<24x24xbf16>, vector<8x24xf32> -> vector<8x24xf32>
    %c0_40 = arith.constant 0 : index
    %c0_41 = arith.constant 0 : index
    %55 = vector.load %arg15[%c0_40, %c0_41] : memref<1x24xf32, #tpu.memory_space<vmem>>, vector<1x24xf32>
    %56 = vector.broadcast %55 : vector<1x24xf32> to vector<8x24xf32>
    %57 = arith.addf %54, %56 : vector<8x24xf32>
    %cst_42 = arith.constant 0.000000e+00 : f32
    %58 = vector.broadcast %cst_42 : f32 to vector<8x24xf32>
    %59 = arith.maximumf %57, %58 : vector<8x24xf32>
    %60 = arith.addf %59, %43 : vector<8x24xf32>
    %cst_43 = arith.constant 0.000000e+00 : f32
    %61 = vector.broadcast %cst_43 : f32 to vector<8x24xf32>
    %62 = arith.maximumf %60, %61 : vector<8x24xf32>
    %63 = arith.truncf %62 : vector<8x24xf32> to vector<8x24xbf16>
    %c0_44 = arith.constant 0 : index
    %c0_45 = arith.constant 0 : index
    %64 = vector.load %arg16[%c0_44, %c0_45] : memref<24x8xbf16, #tpu.memory_space<vmem>>, vector<24x8xbf16>
    %cst_46 = arith.constant dense<0.000000e+00> : vector<8x8xf32>
    %65 = tpu.matmul %63, %64, %cst_46 {dimension_numbers = #tpu.dot_dimension_numbers<[1], [0], [0], [1], [0, 0, 1, 1], [], []>} : vector<8x24xbf16>, vector<24x8xbf16>, vector<8x8xf32> -> vector<8x8xf32>
    %c0_47 = arith.constant 0 : index
    %c0_48 = arith.constant 0 : index
    %66 = vector.load %arg17[%c0_47, %c0_48] : memref<1x8xf32, #tpu.memory_space<vmem>>, vector<1x8xf32>
    %67 = vector.broadcast %66 : vector<1x8xf32> to vector<8x8xf32>
    %68 = arith.addf %65, %67 : vector<8x8xf32>
    %cst_49 = arith.constant 0.000000e+00 : f32
    %69 = vector.broadcast %cst_49 : f32 to vector<8x8xf32>
    %70 = arith.maximumf %68, %69 : vector<8x8xf32>
    %c0_50 = arith.constant 0 : index
    %c0_51 = arith.constant 0 : index
    %71 = vector.load %arg18[%c0_50, %c0_51] : memref<8x8xf32, #tpu.memory_space<vmem>>, vector<8x8xf32>
    tpu.vector_store %arg18[%c0_50, %c0_51], %70 {strides = array<i32>} : memref<8x8xf32, #tpu.memory_space<vmem>>, vector<8x8xf32>,
    return
  }
  func.func @transform_0(%arg0: i32) -> (i32, i32) {
    %c0_i32 = arith.constant 0 : i32
    %c0_i32_0 = arith.constant 0 : i32
    return %arg0, %c0_i32 : i32, i32
  }
  func.func @transform_1(%arg0: i32) -> (i32, i32) {
    %c0_i32 = arith.constant 0 : i32
    %c0_i32_0 = arith.constant 0 : i32
    %c0_i32_1 = arith.constant 0 : i32
    return %c0_i32, %c0_i32_0 : i32, i32
  }
  func.func @transform_2(%arg0: i32) -> (i32, i32) {
    %c0_i32 = arith.constant 0 : i32
    %c0_i32_0 = arith.constant 0 : i32
    %c0_i32_1 = arith.constant 0 : i32
    return %c0_i32, %c0_i32_0 : i32, i32
  }
  func.func @transform_3(%arg0: i32) -> (i32, i32) {
    %c0_i32 = arith.constant 0 : i32
    %c0_i32_0 = arith.constant 0 : i32
    %c0_i32_1 = arith.constant 0 : i32
    return %c0_i32, %c0_i32_0 : i32, i32
  }
  func.func @transform_4(%arg0: i32) -> (i32, i32) {
    %c0_i32 = arith.constant 0 : i32
    %c0_i32_0 = arith.constant 0 : i32
    %c0_i32_1 = arith.constant 0 : i32
    return %c0_i32, %c0_i32_0 : i32, i32
  }
  func.func @transform_5(%arg0: i32) -> (i32, i32) {
    %c0_i32 = arith.constant 0 : i32
    %c0_i32_0 = arith.constant 0 : i32
    %c0_i32_1 = arith.constant 0 : i32
    return %c0_i32, %c0_i32_0 : i32, i32
  }
  func.func @transform_6(%arg0: i32) -> (i32, i32) {
    %c0_i32 = arith.constant 0 : i32
    %c0_i32_0 = arith.constant 0 : i32
    %c0_i32_1 = arith.constant 0 : i32
    return %c0_i32, %c0_i32_0 : i32, i32
  }
  func.func @transform_7(%arg0: i32) -> (i32, i32) {
    %c0_i32 = arith.constant 0 : i32
    %c0_i32_0 = arith.constant 0 : i32
    %c0_i32_1 = arith.constant 0 : i32
    return %c0_i32, %c0_i32_0 : i32, i32
  }
  func.func @transform_8(%arg0: i32) -> (i32, i32) {
    %c0_i32 = arith.constant 0 : i32
    %c0_i32_0 = arith.constant 0 : i32
    %c0_i32_1 = arith.constant 0 : i32
    return %c0_i32, %c0_i32_0 : i32, i32
  }
  func.func @transform_9(%arg0: i32) -> (i32, i32) {
    %c0_i32 = arith.constant 0 : i32
    %c0_i32_0 = arith.constant 0 : i32
    %c0_i32_1 = arith.constant 0 : i32
    return %c0_i32, %c0_i32_0 : i32, i32
  }
  func.func @transform_10(%arg0: i32) -> (i32, i32) {
    %c0_i32 = arith.constant 0 : i32
    %c0_i32_0 = arith.constant 0 : i32
    %c0_i32_1 = arith.constant 0 : i32
    return %c0_i32, %c0_i32_0 : i32, i32
  }
  func.func @transform_11(%arg0: i32) -> (i32, i32) {
    %c0_i32 = arith.constant 0 : i32
    %c0_i32_0 = arith.constant 0 : i32
    %c0_i32_1 = arith.constant 0 : i32
    return %c0_i32, %c0_i32_0 : i32, i32
  }
  func.func @transform_12(%arg0: i32) -> (i32, i32) {
    %c0_i32 = arith.constant 0 : i32
    %c0_i32_0 = arith.constant 0 : i32
    %c0_i32_1 = arith.constant 0 : i32
    return %c0_i32, %c0_i32_0 : i32, i32
  }
  func.func @transform_13(%arg0: i32) -> (i32, i32) {
    %c0_i32 = arith.constant 0 : i32
    %c0_i32_0 = arith.constant 0 : i32
    %c0_i32_1 = arith.constant 0 : i32
    return %c0_i32, %c0_i32_0 : i32, i32
  }
  func.func @transform_14(%arg0: i32) -> (i32, i32) {
    %c0_i32 = arith.constant 0 : i32
    %c0_i32_0 = arith.constant 0 : i32
    %c0_i32_1 = arith.constant 0 : i32
    return %c0_i32, %c0_i32_0 : i32, i32
  }
  func.func @transform_15(%arg0: i32) -> (i32, i32) {
    %c0_i32 = arith.constant 0 : i32
    %c0_i32_0 = arith.constant 0 : i32
    %c0_i32_1 = arith.constant 0 : i32
    return %c0_i32, %c0_i32_0 : i32, i32
  }
  func.func @transform_16(%arg0: i32) -> (i32, i32) {
    %c0_i32 = arith.constant 0 : i32
    %c0_i32_0 = arith.constant 0 : i32
    %c0_i32_1 = arith.constant 0 : i32
    return %c0_i32, %c0_i32_0 : i32, i32
  }
  func.func @transform_17(%arg0: i32) -> (i32, i32) {
    %c0_i32 = arith.constant 0 : i32
    %c0_i32_0 = arith.constant 0 : i32
    return %arg0, %c0_i32 : i32, i32
  }
}

</mosaic_0001>

<bundles_post_ra>
// kernel: tpu_custom_call.1
= control target key start
LH: loop header
LB: loop body
LE: loop exit
PB: predicated region body
PF: predicated region fallthrough
CT: control target
= control target key end

     0   :  { %s926_s0 = inlined_call_operand.hbm [shape: f32[8,16], index: 0, kind: input, shape index: {}]   ;;  %s927_s1 = inlined_call_operand.hbm [shape: bf16[16,64], index: 1, kind: input, shape index: {}]   ;;  %s928_s2 = inlined_call_operand.vmem [shape: f32[1,64], index: 2, kind: input, shape index: {}]   ;;  %s929_s3 = inlined_call_operand.vmem [shape: bf16[64,64], index: 3, kind: input, shape index: {}]   ;;  %s930_s4 = inlined_call_operand.vmem [shape: f32[1,64], index: 4, kind: input, shape index: {}]   ;;  %s931_s5 = inlined_call_operand.vmem [shape: bf16[64,64], index: 5, kind: input, shape index: {}]   ;;  %s932_s6 = inlined_call_operand.vmem [shape: f32[1,64], index: 6, kind: input, shape index: {}]   ;;  %s933_s7 = inlined_call_operand.vmem [shape: bf16[64,32], index: 7, kind: input, shape index: {}]   ;;  %s934_s8 = inlined_call_operand.hbm [shape: f32[1,32], index: 8, kind: input, shape index: {}]   ;;  %s935_s9 = inlined_call_operand.vmem [shape: bf16[32,24], index: 9, kind: input, shape index: {}]   ;;  %s936_s10 = inlined_call_operand.vmem [shape: f32[1,24], index: 10, kind: input, shape index: {}]   ;;  %s937_s11 = inlined_call_operand.vmem [shape: bf16[24,24], index: 11, kind: input, shape index: {}]   ;;  %s938_s12 = inlined_call_operand.vmem [shape: f32[1,24], index: 12, kind: input, shape index: {}]   ;;  %s939_s13 = inlined_call_operand.hbm [shape: bf16[24,24], index: 13, kind: input, shape index: {}]   ;;  %s940_s14 = inlined_call_operand.vmem [shape: f32[1,24], index: 14, kind: input, shape index: {}]   ;;  %s941_s15 = inlined_call_operand.vmem [shape: bf16[24,8], index: 15, kind: input, shape index: {}]   ;;  %s942_s16 = inlined_call_operand.vmem [shape: f32[1,8], index: 16, kind: input, shape index: {}]   ;;  %s943_s17 = inlined_call_operand.hbm [shape: f32[8,8], index: 17, kind: output, shape index: {}]  }
   0x1   :  { %944 = sst [smem:[#allocation15_spill]] %s926_s0 }
   0x2   :  { %945 = sst [smem:[#allocation16_spill]] %s927_s1 }
   0x3   :  { %946 = sst [smem:[#allocation17_spill]] %s942_s16 }
   0x4   :  { %947 = sst [smem:[#allocation18_spill]] %s943_s17 }
   0x5   :  { %22 = vsyncpa [#allocation3], 0 }
   0x6   :  { %23 = vsyncpa [#allocation6], 0 }
   0x7   :  { %24 = vsyncpa [#allocation9], 0  ;;  %s948_s26 = sld [smem:[#allocation16_spill]] }
   0xd   :  { %s41_s27 = sshll.u32 %s948_s26, 4  ;;  %s42_s27 = int_to_ptr.hbm [resolvable:$true] %s41_s27 }
   0xe   :  { %25 = vsyncpa [#allocation4], 0  ;;  %s730_s28 = smov [#allocation5]   ;;  %s949_s18 = sld [smem:[#allocation15_spill]] }
   0xf   :  { %s43_s29 = sshll.u32 %s730_s28, 4  ;;  %s731_s1 = smov 64   ;;  %s44_s29 = int_to_ptr.vmem [resolvable:$true] %s43_s29 }
  0x10   :  { %s732_s20 = smov 4   ;;  %s733_s21 = smov [#allocation2]  }
  0x11   :  { %49 = dma.hbm_to_vmem [thread:$0]  %s42_s27, 128, %s44_s29, [#allocation6], %s731_s1, %s731_s1, %s732_s20  }
  0x12   :  { %s33_s22 = sshll.u32 %s733_s21, 4  ;;  %s67_s24 = sshll.u32 %s934_s8, 4  ;;  %s34_s22 = int_to_ptr.vmem [resolvable:$true] %s33_s22  ;;  %s68_s24 = int_to_ptr.hbm [resolvable:$true] %s67_s24 }
  0x13   :  { %s85_s28 = sshll.u32 %s939_s13, 4  ;;  %s734_s16 = smov [#allocation7]   ;;  %s86_s28 = int_to_ptr.hbm [resolvable:$true] %s85_s28 }
  0x14   :  { %s31_s19 = sshll.u32 %s949_s18, 4  ;;  %s69_s0 = sshll.u32 %s734_s16, 4  ;;  %s32_s19 = int_to_ptr.hbm [resolvable:$true] %s31_s19  ;;  %s70_s0 = int_to_ptr.vmem [resolvable:$true] %s69_s0 }
  0x15   :  { %36 = dma.hbm_to_vmem [thread:$0]  %s32_s19, 128, %s34_s22, [#allocation3]  }
  0x16   :  { %72 = dma.hbm_to_vmem [thread:$0]  %s68_s24, 16, %s70_s0, [#allocation6]  }
  0x17   :  { %s735_s27 = smov [#allocation8]  }
  0x18   :  { %s87_s29 = sshll.u32 %s735_s27, 4  ;;  %s88_s29 = int_to_ptr.vmem [resolvable:$true] %s87_s29 }
  0x19   :  { %93 = dma.hbm_to_vmem [thread:$0]  %s86_s28, 192, %s88_s29, [#allocation9], %s731_s1, %s731_s1, %s732_s20  }
  0x1a   :  { %722 = dma.done.wait [#allocation3], 128  }
  0x1b   :  { %723 = vsyncadd [#allocation3], 4294967168 }
  0x1c   :  { %724 = dma.done.wait [#allocation6], 144  }
  0x1d   :  { %725 = vsyncadd [#allocation6], 4294967152 }
  0x1e   :  { %726 = dma.done.wait [#allocation9], 192  }
  0x1f   :  { %727 = vsyncadd [#allocation9], 4294967104  ;;  %v569_v0 = vld [vmem:[#allocation5] sm:$0xff]  ;;  %v117_v1 = vld [vmem:[#allocation2] sm:$0xff]  ;;  %vm131_vm0 = vcmask 130048   ;;  %vm186_vm1 = vcmask 523264  }
  0x20   :  { %v573_v2 = vld [vmem:[%s929_s3 + $0x18] sm:$0xff]  ;;  %v118_v3 = vpack.c.bf16 %v117_v1, %v117_v1  ;;  %v572_v4 = vld [vmem:[%s929_s3 + $0x10] sm:$0xff]  ;;  %142 = vmatpush.bf16.msra.mxu0 %v569_v0  ;;  %v571_v5 = vld [vmem:[%s929_s3 + $0x8] sm:$0xff]  ;;  %vm374_vm2 = vcmask 1043456   ;;  %vm335_vm3 = vcmask 261120   ;;  %vm370_vm4 = vcmask 195584  }
  0x21   :  { %194 = vmatpush.bf16.msra.mxu1 %v573_v2  ;;  %v570_v6 = vld [vmem:[%s929_s3] sm:$0xff]  ;;  %v577_v7 = vld [vmem:[%s931_s5 + $0x18] sm:$0xff]  ;;  %v576_v8 = vld [vmem:[%s931_s5 + $0x10] sm:$0xff]  ;;  %s950_s8 = sld [smem:[#allocation17_spill]]  ;;  %vm468_vm5 = vcmask 64512  }
  0x22   :  { %248 = vmatpush.bf16.msra.mxu2 %v577_v7  ;;  %v594_v9 = vld [vmem:[%s928_s2] ss:$0 sm:$0xff]  ;;  %v575_v15 = vld [vmem:[%s931_s5 + $0x8] sm:$0xff]  ;;  %v581_v17 = vld [vmem:[%s933_s7 + $0x18] sm:$0xff]  ;;  %s951_s16 = sld [smem:[#allocation18_spill]] }
  0x23   :  { %493 = vmatmul.msk.bf16.vlgmr.msra.gmra.mxu0 %vm131_vm0, %v118_v3  ;;  %v574_v16 = vld [vmem:[%s931_s5] sm:$0xff]  ;;  %304 = vmatpush.bf16.msra.mxu3 %v581_v17  ;;  %v580_v24 = vld [vmem:[%s933_s7 + $0x10] sm:$0xff]  ;;  %v579_v25 = vld [vmem:[%s933_s7 + $0x8] sm:$0xff] }
  0x24   :  { %v595_v18 = vld [vmem:[%s930_s4] ss:$0 sm:$0xff]  ;;  %v583_v27 = vld [vmem:[%s935_s9 + $0x8] sm:$0xff]  ;;  %v597_v42 = vld [vmem:[#allocation7] ss:$0 sm:$0xff] }
  0x25   :  { %195 = vmatpush.bf16.msra.mxu1 %v572_v4  ;;  %v578_v26 = vld [vmem:[%s933_s7] sm:$0xff]  ;;  %345 = vmatpush.bf16.msrb.mxu0 %v583_v27  ;;  %v356_v37 = vld [vmem:[%s937_s11 + $0x8] sm:$0xf]  ;;  %v395_v48 = vld [vmem:[#allocation8 + $0x8] sm:$0xf] }
  0x26   :  { %249 = vmatpush.bf16.msra.mxu2 %v576_v8  ;;  %v582_v28 = vld [vmem:[%s935_s9] sm:$0xff]  ;;  %v366_v38 = vunpack.c.l.b16 %v356_v37  ;;  %v405_v49 = vunpack.c.l.b16 %v395_v48  ;;  %v585_v52 = vld [vmem:[#allocation8] sm:$0xff]  ;;  %v434_v59 = vld [vmem:[%s941_s15 + $0x8] sm:$0xf] }
  0x27   :  { %305 = vmatpush.bf16.msra.mxu3 %v580_v24  ;;  %v596_v29 = vld [vmem:[%s932_s6] ss:$0 sm:$0xff]  ;;  %v444_v60 = vunpack.c.l.b16 %v434_v59 }
  0x28   :  { %v368_v39 = vpack.c.b16 %v366_v38, %v366_v38  ;;  %v584_v41 = vld [vmem:[%s937_s11] sm:$0xff]  ;;  %v407_v50 = vpack.c.b16 %v405_v49, %v405_v49 }
  0x29   :  { %196 = vmatpush.bf16.msra.mxu1 %v571_v5  ;;  %346 = vmatpush.bf16.msrb.mxu0 %v582_v28  ;;  %v598_v53 = vld [vmem:[%s936_s10] ss:$0 sm:$0xff]  ;;  %v446_v61 = vpack.c.b16 %v444_v60, %v444_v60 }
  0x2a   :  { %250 = vmatpush.bf16.msra.mxu2 %v575_v15  ;;  %v376_v40 = vsel %vm374_vm2, %v368_v39, 0  ;;  %v413_v51 = vsel %vm374_vm2, %v407_v50, 0  ;;  %v599_v63 = vld [vmem:[%s938_s12] ss:$0 sm:$0xff] }
  0x2b   :  { %306 = vmatpush.bf16.msra.mxu3 %v579_v25  ;;  %v452_v62 = vsel %vm374_vm2, %v446_v61, 0  ;;  %v586_v5 = vld [vmem:[%s941_s15] sm:$0xff]  ;;  %s736_s15 = smov [#allocation10]  }
  0x2c   :  { %s475_s17 = sshll.u32 %s736_s15, 4  ;;  %s476_s17 = int_to_ptr.vmem [resolvable:$true] %s475_s17 }
  0x2d   :  { %197 = vmatpush.bf16.msra.mxu1 %v570_v6  ;;  %v600_v6 = vld [vmem:[%s940_s14] ss:$0 sm:$0xff]  ;;  %s477_s14 = sshll.u32 %s951_s16, 4  ;;  %s478_s14 = int_to_ptr.hbm [resolvable:$true] %s477_s14 }
  0x2e   :  { %251 = vmatpush.bf16.msra.mxu2 %v574_v16 }
  0x2f   :  { %307 = vmatpush.bf16.msra.mxu3 %v578_v26 }
  0x31   :  { %384 = vmatpush.bf16.msrb.mxu1 %v376_v40 }
  0x32   :  { %421 = vmatpush.bf16.msrb.mxu2 %v413_v51 }
  0x33   :  { %460 = vmatpush.bf16.msrb.mxu3 %v452_v62 }
  0x35   :  { %385 = vmatpush.bf16.msrb.mxu1 %v584_v41 }
  0x36   :  { %422 = vmatpush.bf16.msrb.mxu2 %v585_v52 }
  0x37   :  { %461 = vmatpush.bf16.msrb.mxu3 %v586_v5 }
  0xa0   :  { %v144_v10 = vpop.f32.mrf.mxu0 }
  0xa1   :  { %v145_v11 = vadd.f32 %v594_v9, %v144_v10 }
  0xa3   :  { %v148_v12 = vmax.f32 %v145_v11, 0.0 }
  0xa5   :  { %v149_v13 = vpack.c.bf16 %v148_v12, %v148_v12 }
  0xa7   :  { %510 = vmatmul.msk.bf16.vlgmr.msra.gmra.mxu1 %vm186_vm1, %v149_v13 }
  0xa8   :  { %v146_v14 = vpop.f32.mrf.mxu0 }
  0xa9   :  { %v601_v14 = vld [vmem:[%s950_s8] ss:$0 sm:$0xff] }
 0x124   :  { %v199_v19 = vpop.f32.mrf.mxu1 }
 0x125   :  { %v200_v20 = vadd.f32 %v595_v18, %v199_v19 }
 0x127   :  { %v203_v21 = vmax.f32 %v200_v20, 0.0 }
 0x129   :  { %v204_v22 = vpack.c.bf16 %v203_v21, %v203_v21 }
 0x12b   :  { %527 = vmatmul.msk.bf16.vlgmr.msra.gmra.mxu2 %vm186_vm1, %v204_v22 }
 0x12c   :  { %v201_v23 = vpop.f32.mrf.mxu1 }
 0x1ae   :  { %v253_v30 = vpop.f32.mrf.mxu2 }
 0x1af   :  { %v254_v31 = vadd.f32 %v596_v29, %v253_v30 }
 0x1b1   :  { %v257_v32 = vmax.f32 %v254_v31, 0.0 }
 0x1b3   :  { %v258_v33 = vadd.f32 %v257_v32, %v148_v12 }
 0x1b5   :  { %v259_v34 = vmax.f32 %v258_v33, 0.0 }
 0x1b6   :  { %v255_v35 = vpop.f32.mrf.mxu2 }
 0x1b7   :  { %v260_v36 = vpack.c.bf16 %v259_v34, %v259_v34 }
 0x1b9   :  { %544 = vmatmul.msk.bf16.vlgmr.msra.gmra.mxu3 %vm186_vm1, %v260_v36 }
 0x23c   :  { %v309_v43 = vpop.f32.mrf.mxu3 }
 0x23d   :  { %v310_v44 = vadd.f32 %v597_v42, %v309_v43 }
 0x23f   :  { %v313_v45 = vmax.f32 %v310_v44, 0.0 }
 0x241   :  { %v314_v46 = vpack.c.bf16 %v313_v45, %v313_v45 }
 0x243   :  { %553 = vmatmul.msk.bf16.vlgmr.msrb.gmra.mxu0 %vm335_vm3, %v314_v46 }
 0x244   :  { %v311_v47 = vpop.f32.mrf.mxu3 }
 0x2c0   :  { %v348_v54 = vpop.f32.mrf.mxu0 }
 0x2c1   :  { %v349_v55 = vadd.f32 %v598_v53, %v348_v54 }
 0x2c3   :  { %v352_v56 = vmax.f32 %v349_v55, 0.0 }
 0x2c5   :  { %v353_v57 = vpack.c.bf16 %v352_v56, %v352_v56 }
 0x2c7   :  { %558 = vmatmul.msk.bf16.vlgmr.msrb.gmra.mxu1 %vm370_vm4, %v353_v57 }
 0x2c8   :  { %v350_v58 = vpop.f32.mrf.mxu0 }
 0x344   :  { %v387_v0 = vpop.f32.mrf.mxu1 }
 0x345   :  { %v388_v1 = vadd.f32 %v599_v63, %v387_v0 }
 0x347   :  { %v391_v2 = vmax.f32 %v388_v1, 0.0 }
 0x349   :  { %v392_v3 = vpack.c.bf16 %v391_v2, %v391_v2 }
 0x34b   :  { %563 = vmatmul.msk.bf16.vlgmr.msrb.gmra.mxu2 %vm370_vm4, %v392_v3 }
 0x34c   :  { %v389_v4 = vpop.f32.mrf.mxu1 }
 0x3ce   :  { %v424_v7 = vpop.f32.mrf.mxu2 }
 0x3cf   :  { %v425_v8 = vadd.f32 %v600_v6, %v424_v7 }
 0x3d1   :  { %v428_v9 = vmax.f32 %v425_v8, 0.0 }
 0x3d3   :  { %v429_v10 = vadd.f32 %v428_v9, %v352_v56 }
 0x3d5   :  { %v430_v11 = vmax.f32 %v429_v10, 0.0 }
 0x3d6   :  { %v426_v12 = vpop.f32.mrf.mxu2 }
 0x3d7   :  { %v431_v13 = vpack.c.bf16 %v430_v11, %v430_v11 }
 0x3d9   :  { %568 = vmatmul.msk.bf16.vlgmr.msrb.gmra.mxu3 %vm370_vm4, %v431_v13 }
 0x45c   :  { %v463_v15 = vpop.f32.mrf.mxu3 }
 0x45d   :  { %v464_v16 = vadd.f32 %v601_v14, %v463_v15 }
 0x45f   :  { %v467_v17 = vmax.f32 %v464_v16, 0.0 }
 0x461   :  { %469 = vst.msk [vmem:[#allocation10] sm:$0xff] %vm468_vm5, %v467_v17 }
 0x462   :  { %480 = dma.vmem_to_hbm [thread:$0]  %s476_s17, 128, %s478_s14, [#allocation4]  }
 0x464   :  { %v465_v18 = vpop.f32.mrf.mxu3 }
 0x465   :  { %728 = dma.done.wait [#allocation4], 128  }
 0x466   :  { %729 = vsyncadd [#allocation4], 4294967168 }
 0x467   :  { %485 = vsyncpa [#allocation3], 1 }
 0x468   :  { %486 = vsyncpa [#allocation6], 1 }
 0x469   :  { %487 = vsyncpa [#allocation9], 1 }
 0x46a   :  { %488 = vsyncpa [#allocation4], 1 }

</bundles_post_ra>
